<compile_context>
chip_gen: v7x
topology: tpu7x:2x2x1
jax: 0.10.0
libtpu: 0.0.40
codegen_flags: <defaults>
</compile_context>

<pallas_src>
import functools
import math

import jax
import jax.numpy as jnp
from jax.experimental import pallas as pl
from jax.experimental.pallas import tpu as pltpu


def _mha_kernel(q_ref, k_ref, v_ref,
                w_in_ref, b_in_ref, w_out_ref, b_out_ref,
                out_ref, *rest,
                nhead: int, head_dim: int, with_attn: bool):
    """Grid = (batch, L-tile). K/V projected once per batch into lane-dense scratch."""
    if with_attn:
        attnw_ref, kv_ref, ctx_ref = rest
    else:
        kv_ref, ctx_ref = rest

    f32 = jnp.float32
    cdtype = q_ref.dtype
    H = nhead
    hd = head_dim
    E = H * hd
    scale = 1.0 / math.sqrt(hd)
    inv_nhead = 1.0 / H

    # ---- K/V projection: only on the first L-tile of each batch element ----
    # Full-width GEMMs (N = E); result stored lane-dense as (2, S, E).
    # NOTE: this carries state across L-tiles, so the L grid axis must stay
    # "arbitrary" (sequential).
    @pl.when(pl.program_id(1) == 0)
    def _project_kv():
        k = k_ref[0]                                           # (S, E)
        v = v_ref[0]                                           # (S, E)
        kp = jnp.dot(k, w_in_ref[:, E:2 * E],
                     preferred_element_type=f32) + b_in_ref[:, E:2 * E]
        vp = jnp.dot(v, w_in_ref[:, 2 * E:3 * E],
                     preferred_element_type=f32) + b_in_ref[:, 2 * E:3 * E]
        kv_ref[0] = kp.astype(cdtype)                          # (S, E)
        kv_ref[1] = vp.astype(cdtype)                          # (S, E)

    # ---- Q projection for this L-tile: one full-width GEMM, scaled after bias ----
    q = q_ref[0]                                               # (TL, E)
    qp = (jnp.dot(q, w_in_ref[:, 0:E], preferred_element_type=f32)
          + b_in_ref[:, 0:E]) * scale
    qp = qp.astype(cdtype)                                     # (TL, E)

    kp = kv_ref[0]                                             # (S, E)
    vp = kv_ref[1]                                             # (S, E)
    TL = qp.shape[0]
    S = kp.shape[0]

    if with_attn:
        attn_acc = jnp.zeros((TL, S), f32)

    # ---- per-head attention via static lane slices (only one (TL,S) live) ----
    for h in range(H):
        lo = h * hd
        hi = lo + hd
        q_h = qp[:, lo:hi]                                     # (TL, hd)
        k_h = kp[:, lo:hi]                                     # (S, hd)
        v_h = vp[:, lo:hi]                                     # (S, hd)

        # scores: contract hd of both operands (no explicit transpose).
        s = jax.lax.dot_general(q_h, k_h, (((1,), (1,)), ((), ())),
                                preferred_element_type=f32)    # (TL, S)
        m = jnp.max(s, axis=-1, keepdims=True)
        e = jnp.exp(s - m)
        p = e * pl.reciprocal(jnp.sum(e, axis=-1, keepdims=True), approx=True)

        if with_attn:
            attn_acc = attn_acc + p

        ctx_h = jnp.dot(p.astype(cdtype), v_h,
                        preferred_element_type=f32)            # (TL, hd)
        # pack lane-dense so the out-proj is a single K=E GEMM.
        ctx_ref[:, lo:hi] = ctx_h.astype(cdtype)

    if with_attn:
        attnw_ref[0] = (attn_acc * inv_nhead).astype(attnw_ref.dtype)

    # ---- fused output projection: one (TL,E)@(E,E) GEMM + bias ----
    out = jnp.dot(ctx_ref[...], w_out_ref[...],
                  preferred_element_type=f32) + b_out_ref[...]
    out_ref[0] = out.astype(out_ref.dtype)


def _round_up(x: int, m: int) -> int:
    return ((x + m - 1) // m) * m


def multihead_attention_pallas(query, key, value, params, *, nhead: int,
                               return_attn_weights: bool = True):
    """query (B,L,E), key/value (B,S,E) -> (output (B,L,E)[, attn (B,L,S)])."""
    B, L, E = query.shape
    S = key.shape[1]
    assert E % nhead == 0
    hd = E // nhead
    cdtype = query.dtype

    # ---- weights: fused, pre-transposed for right-multiplication ----
    w_in_t = params["in_proj_weight"].T.astype(cdtype)         # (E, 3E) = [Wq^T|Wk^T|Wv^T]
    b_in = params["in_proj_bias"].reshape(1, 3 * E).astype(cdtype)
    w_out_t = params["out_proj_weight"].T.astype(cdtype)       # (E, E)
    b_out = params["out_proj_bias"].reshape(1, E).astype(cdtype)

    # ---- L tiling: pad L to a sublane-aligned tile (target 128) ----
    itemsize = jnp.dtype(cdtype).itemsize
    sub = 8 if itemsize >= 4 else (16 if itemsize == 2 else 32)
    TL = 128 if L >= 128 else _round_up(L, sub)
    L_pad = _round_up(L, TL)
    if L_pad != L:
        query = jnp.pad(query, ((0, 0), (0, L_pad - L), (0, 0)))
    n_l = L_pad // TL

    kernel = functools.partial(_mha_kernel, nhead=nhead, head_dim=hd,
                               with_attn=return_attn_weights)

    # Whole-array VMEM residency for the (grid-constant) weights/biases:
    # avoids double-buffering them in the pipeline.
    vmem_full = pl.BlockSpec(memory_space=pltpu.MemorySpace.VMEM)

    in_specs = [
        pl.BlockSpec((1, TL, E), lambda b, l: (b, l, 0)),   # query tile
        pl.BlockSpec((1, S, E), lambda b, l: (b, 0, 0)),    # key   (resident per batch)
        pl.BlockSpec((1, S, E), lambda b, l: (b, 0, 0)),    # value (resident per batch)
        vmem_full,                                          # fused in-proj weight (E, 3E)
        vmem_full,                                          # fused in-proj bias   (1, 3E)
        vmem_full,                                          # out-proj weight      (E, E)
        vmem_full,                                          # out-proj bias        (1, E)
    ]

    out_shapes = [jax.ShapeDtypeStruct((B, L_pad, E), cdtype)]
    out_specs = [pl.BlockSpec((1, TL, E), lambda b, l: (b, l, 0))]
    if return_attn_weights:
        # emitted in the input dtype (torch also returns input-dtype weights);
        # halves writeback traffic for bf16 inputs.
        out_shapes.append(jax.ShapeDtypeStruct((B, L_pad, S), cdtype))
        out_specs.append(pl.BlockSpec((1, TL, S), lambda b, l: (b, l, 0)))

    scratch_shapes = [
        pltpu.VMEM((2, S, E), cdtype),   # projected K/V, lane-dense
        pltpu.VMEM((TL, E), cdtype),     # per-tile packed context, lane-dense
    ]

    result = pl.pallas_call(
        kernel,
        out_shape=tuple(out_shapes),
        grid_spec=pltpu.PrefetchScalarGridSpec(
            num_scalar_prefetch=0,
            grid=(B, n_l),
            in_specs=in_specs,
            out_specs=tuple(out_specs),
            scratch_shapes=scratch_shapes,
        ),
        compiler_params=pltpu.CompilerParams(
            # L axis must stay "arbitrary": the KV scratch is filled at l==0
            # and reused by later L-tiles of the same batch element.
            dimension_semantics=("parallel", "arbitrary"),
            # <= ~75% of v7x's 64 MiB/TC; plenty of headroom on v5e/v6e.
            vmem_limit_bytes=48 * 1024 * 1024,
        ),
    )(query, key, value, w_in_t, b_in, w_out_t, b_out)

    if return_attn_weights:
        out, attn = result
        return out[:, :L], attn[:, :L]
    (out,) = result
    return out[:, :L]


def _reference_mha(query, key, value, params, *, nhead: int):
    """Pure-JAX reference mirroring torch.nn.MultiheadAttention (eval, no mask)."""
    B, L, E = query.shape
    S = key.shape[1]
    hd = E // nhead
    w = params["in_proj_weight"]
    b = params["in_proj_bias"]
    q = query @ w[:E].T + b[:E]
    k = key @ w[E:2 * E].T + b[E:2 * E]
    v = value @ w[2 * E:].T + b[2 * E:]
    q = q.reshape(B, L, nhead, hd).transpose(0, 2, 1, 3) / math.sqrt(hd)
    k = k.reshape(B, S, nhead, hd).transpose(0, 2, 1, 3)
    v = v.reshape(B, S, nhead, hd).transpose(0, 2, 1, 3)
    s = jnp.einsum("bhld,bhsd->bhls", q, k)
    p = jax.nn.softmax(s, axis=-1)
    ctx = jnp.einsum("bhls,bhsd->bhld", p, v)
    ctx = ctx.transpose(0, 2, 1, 3).reshape(B, L, E)
    out = ctx @ params["out_proj_weight"].T + params["out_proj_bias"]
    return out, p.mean(axis=1)


if __name__ == "__main__":
    # Small shapes consistent with the module's forward: (B, L, E)
    B, L, S, E, NHEAD = 2, 8, 8, 32, 4

    key0 = jax.random.PRNGKey(0)
    kq, kk, kv, kw1, kw2, kb1, kb2 = jax.random.split(key0, 7)

    query = jax.random.normal(kq, (B, L, E), dtype=jnp.float32)
    key_t = jax.random.normal(kk, (B, S, E), dtype=jnp.float32)
    value = jax.random.normal(kv, (B, S, E), dtype=jnp.float32)

    # Deterministic parameter init (shapes follow nn.MultiheadAttention).
    bound = 1.0 / math.sqrt(E)
    params = {
        "in_proj_weight": jax.random.uniform(kw1, (3 * E, E), jnp.float32, -bound, bound),
        "in_proj_bias": jax.random.uniform(kb1, (3 * E,), jnp.float32, -bound, bound),
        "out_proj_weight": jax.random.uniform(kw2, (E, E), jnp.float32, -bound, bound),
        "out_proj_bias": jax.random.uniform(kb2, (E,), jnp.float32, -bound, bound),
    }

    out, attn = multihead_attention_pallas(query, key_t, value, params,
                                           nhead=NHEAD, return_attn_weights=True)
    out_only = multihead_attention_pallas(query, key_t, value, params,
                                          nhead=NHEAD, return_attn_weights=False)
    jax.block_until_ready((out, attn, out_only))

    # Sanity check against pure-JAX reference.  Tolerance is slightly looser than
    # pure-f32 because the softmax uses the EUP approximate reciprocal.
    ref_out, ref_attn = _reference_mha(query, key_t, value, params, nhead=NHEAD)
    assert out.shape == (B, L, E) and attn.shape == (B, L, S)
    assert jnp.allclose(out, ref_out, atol=3e-3, rtol=3e-3), \
        float(jnp.max(jnp.abs(out - ref_out)))
    assert jnp.allclose(attn, ref_attn, atol=3e-3, rtol=3e-3), \
        float(jnp.max(jnp.abs(attn - ref_attn)))
    assert jnp.allclose(out_only, out, atol=1e-6, rtol=1e-6)

    print("KERNEL_OK")
</pallas_src>

<mosaic_0001>
module attributes {stable_mosaic.version = 11 : i64} {
  func.func @_mha_kernel(%arg0: i32, %arg1: i32, %arg2: memref<1x8x32xf32, #tpu.memory_space<vmem>>, %arg3: memref<1x8x32xf32, #tpu.memory_space<vmem>>, %arg4: memref<1x8x32xf32, #tpu.memory_space<vmem>>, %arg5: memref<32x96xf32, #tpu.memory_space<vmem>>, %arg6: memref<1x96xf32, #tpu.memory_space<vmem>>, %arg7: memref<32x32xf32, #tpu.memory_space<vmem>>, %arg8: memref<1x32xf32, #tpu.memory_space<vmem>>, %arg9: memref<1x8x32xf32, #tpu.memory_space<vmem>>, %arg10: memref<1x8x8xf32, #tpu.memory_space<vmem>>, %arg11: memref<2x8x32xf32, #tpu.memory_space<vmem>>, %arg12: memref<8x32xf32, #tpu.memory_space<vmem>>) attributes {dimension_semantics = [#tpu.dimension_semantics<parallel>, #tpu.dimension_semantics<arbitrary>], iteration_bounds = array<i64: 2, 1>, scalar_prefetch = 0 : i64, scratch_operands = 2 : i64, tpu.core_type = #tpu.core_type<tc>, window_params = [{transform_indices = @transform_0, window_bounds = array<i64: 1, 8, 32>}, {transform_indices = @transform_1, window_bounds = array<i64: 1, 8, 32>}, {transform_indices = @transform_2, window_bounds = array<i64: 1, 8, 32>}, {pipeline_mode = #tpu.pipeline_mode<synchronous>, transform_indices = @transform_3, window_bounds = array<i64: 32, 96>}, {pipeline_mode = #tpu.pipeline_mode<synchronous>, transform_indices = @transform_4, window_bounds = array<i64: 1, 96>}, {pipeline_mode = #tpu.pipeline_mode<synchronous>, transform_indices = @transform_5, window_bounds = array<i64: 32, 32>}, {pipeline_mode = #tpu.pipeline_mode<synchronous>, transform_indices = @transform_6, window_bounds = array<i64: 1, 32>}, {transform_indices = @transform_7, window_bounds = array<i64: 1, 8, 32>}, {transform_indices = @transform_8, window_bounds = array<i64: 1, 8, 8>}]} {
    %c0_i32 = arith.constant 0 : i32
    %0 = arith.cmpi eq, %arg1, %c0_i32 : i32
    %1 = arith.extui %0 : i1 to i32
    %c0_i32_0 = arith.constant 0 : i32
    %2 = arith.cmpi ne, %1, %c0_i32_0 : i32
    scf.if %2 {
      %c0_49 = arith.constant 0 : index
      %c0_50 = arith.constant 0 : index
      %c0_51 = arith.constant 0 : index
      %99 = vector.load %arg3[%c0_49, %c0_50, %c0_51] : memref<1x8x32xf32, #tpu.memory_space<vmem>>, vector<1x8x32xf32>
      %100 = vector.shape_cast %99 : vector<1x8x32xf32> to vector<8x32xf32>
      %c0_52 = arith.constant 0 : index
      %c0_53 = arith.constant 0 : index
      %c0_54 = arith.constant 0 : index
      %101 = vector.load %arg4[%c0_52, %c0_53, %c0_54] : memref<1x8x32xf32, #tpu.memory_space<vmem>>, vector<1x8x32xf32>
      %102 = vector.shape_cast %101 : vector<1x8x32xf32> to vector<8x32xf32>
      %c0_55 = arith.constant 0 : index
      %c32 = arith.constant 32 : index
      %103 = vector.load %arg5[%c0_55, %c32] : memref<32x96xf32, #tpu.memory_space<vmem>>, vector<32x32xf32>
      %cst_56 = arith.constant dense<0.000000e+00> : vector<8x32xf32>
      %104 = tpu.matmul %100, %103, %cst_56 {dimension_numbers = #tpu.dot_dimension_numbers<[1], [0], [0], [1], [0, 0, 1, 1], [], []>} : vector<8x32xf32>, vector<32x32xf32>, vector<8x32xf32> -> vector<8x32xf32>
      %c0_57 = arith.constant 0 : index
      %c32_58 = arith.constant 32 : index
      %105 = vector.load %arg6[%c0_57, %c32_58] : memref<1x96xf32, #tpu.memory_space<vmem>>, vector<1x32xf32>
      %106 = vector.broadcast %105 : vector<1x32xf32> to vector<8x32xf32>
      %107 = arith.addf %104, %106 : vector<8x32xf32>
      %c0_59 = arith.constant 0 : index
      %c64 = arith.constant 64 : index
      %108 = vector.load %arg5[%c0_59, %c64] : memref<32x96xf32, #tpu.memory_space<vmem>>, vector<32x32xf32>
      %cst_60 = arith.constant dense<0.000000e+00> : vector<8x32xf32>
      %109 = tpu.matmul %102, %108, %cst_60 {dimension_numbers = #tpu.dot_dimension_numbers<[1], [0], [0], [1], [0, 0, 1, 1], [], []>} : vector<8x32xf32>, vector<32x32xf32>, vector<8x32xf32> -> vector<8x32xf32>
      %c0_61 = arith.constant 0 : index
      %c64_62 = arith.constant 64 : index
      %110 = vector.load %arg6[%c0_61, %c64_62] : memref<1x96xf32, #tpu.memory_space<vmem>>, vector<1x32xf32>
      %111 = vector.broadcast %110 : vector<1x32xf32> to vector<8x32xf32>
      %112 = arith.addf %109, %111 : vector<8x32xf32>
      %c0_63 = arith.constant 0 : index
      %c0_64 = arith.constant 0 : index
      %c0_65 = arith.constant 0 : index
      %113 = vector.load %arg11[%c0_63, %c0_64, %c0_65] : memref<2x8x32xf32, #tpu.memory_space<vmem>>, vector<1x8x32xf32>
      %114 = vector.shape_cast %113 : vector<1x8x32xf32> to vector<8x32xf32>
      %115 = vector.shape_cast %107 : vector<8x32xf32> to vector<1x8x32xf32>
      tpu.vector_store %arg11[%c0_63, %c0_64, %c0_65], %115 {strides = array<i32>} : memref<2x8x32xf32, #tpu.memory_space<vmem>>, vector<1x8x32xf32>,
      %c1_66 = arith.constant 1 : index
      %c0_67 = arith.constant 0 : index
      %c0_68 = arith.constant 0 : index
      %116 = vector.load %arg11[%c1_66, %c0_67, %c0_68] : memref<2x8x32xf32, #tpu.memory_space<vmem>>, vector<1x8x32xf32>
      %117 = vector.shape_cast %116 : vector<1x8x32xf32> to vector<8x32xf32>
      %118 = vector.shape_cast %112 : vector<8x32xf32> to vector<1x8x32xf32>
      tpu.vector_store %arg11[%c1_66, %c0_67, %c0_68], %118 {strides = array<i32>} : memref<2x8x32xf32, #tpu.memory_space<vmem>>, vector<1x8x32xf32>,
    } else {
    }
    %c0 = arith.constant 0 : index
    %c0_1 = arith.constant 0 : index
    %c0_2 = arith.constant 0 : index
    %3 = vector.load %arg2[%c0, %c0_1, %c0_2] : memref<1x8x32xf32, #tpu.memory_space<vmem>>, vector<1x8x32xf32>
    %4 = vector.shape_cast %3 : vector<1x8x32xf32> to vector<8x32xf32>
    %c0_3 = arith.constant 0 : index
    %c0_4 = arith.constant 0 : index
    %5 = vector.load %arg5[%c0_3, %c0_4] : memref<32x96xf32, #tpu.memory_space<vmem>>, vector<32x32xf32>
    %cst = arith.constant dense<0.000000e+00> : vector<8x32xf32>
    %6 = tpu.matmul %4, %5, %cst {dimension_numbers = #tpu.dot_dimension_numbers<[1], [0], [0], [1], [0, 0, 1, 1], [], []>} : vector<8x32xf32>, vector<32x32xf32>, vector<8x32xf32> -> vector<8x32xf32>
    %c0_5 = arith.constant 0 : index
    %c0_6 = arith.constant 0 : index
    %7 = vector.load %arg6[%c0_5, %c0_6] : memref<1x96xf32, #tpu.memory_space<vmem>>, vector<1x32xf32>
    %8 = vector.broadcast %7 : vector<1x32xf32> to vector<8x32xf32>
    %9 = arith.addf %6, %8 : vector<8x32xf32>
    %cst_7 = arith.constant 0.353553385 : f32
    %10 = vector.broadcast %cst_7 : f32 to vector<8x32xf32>
    %11 = arith.mulf %9, %10 : vector<8x32xf32>
    %c0_8 = arith.constant 0 : index
    %c0_9 = arith.constant 0 : index
    %c0_10 = arith.constant 0 : index
    %12 = vector.load %arg11[%c0_8, %c0_9, %c0_10] : memref<2x8x32xf32, #tpu.memory_space<vmem>>, vector<1x8x32xf32>
    %13 = vector.shape_cast %12 : vector<1x8x32xf32> to vector<8x32xf32>
    %c1 = arith.constant 1 : index
    %c0_11 = arith.constant 0 : index
    %c0_12 = arith.constant 0 : index
    %14 = vector.load %arg11[%c1, %c0_11, %c0_12] : memref<2x8x32xf32, #tpu.memory_space<vmem>>, vector<1x8x32xf32>
    %15 = vector.shape_cast %14 : vector<1x8x32xf32> to vector<8x32xf32>
    %cst_13 = arith.constant 0.000000e+00 : f32
    %16 = vector.broadcast %cst_13 : f32 to vector<8x8xf32>
    %17 = vector.extract_strided_slice %11 {offsets = [0, 0], sizes = [8, 8], strides = [1, 1]} : vector<8x32xf32> to vector<8x8xf32>
    %18 = vector.extract_strided_slice %13 {offsets = [0, 0], sizes = [8, 8], strides = [1, 1]} : vector<8x32xf32> to vector<8x8xf32>
    %19 = vector.extract_strided_slice %15 {offsets = [0, 0], sizes = [8, 8], strides = [1, 1]} : vector<8x32xf32> to vector<8x8xf32>
    %cst_14 = arith.constant dense<0.000000e+00> : vector<8x8xf32>
    %20 = tpu.matmul %17, %18, %cst_14 {dimension_numbers = #tpu.dot_dimension_numbers<[1], [1], [0], [0], [0, 0, 1, 0], [], []>} : vector<8x8xf32>, vector<8x8xf32>, vector<8x8xf32> -> vector<8x8xf32>
    %cst_15 = arith.constant dense<0xFF800000> : vector<8xf32>
    %21 = vector.multi_reduction <maximumf>, %20, %cst_15 [1] : vector<8x8xf32> to vector<8xf32>
    %22 = vector.shape_cast %21 : vector<8xf32> to vector<8x1xf32>
    %23 = vector.broadcast %22 : vector<8x1xf32> to vector<8x8xf32>
    %24 = arith.subf %20, %23 : vector<8x8xf32>
    %25 = math.exp %24 : vector<8x8xf32>
    %cst_16 = arith.constant dense<0.000000e+00> : vector<8xf32>
    %26 = vector.multi_reduction <add>, %25, %cst_16 [1] : vector<8x8xf32> to vector<8xf32>
    %27 = vector.shape_cast %26 : vector<8xf32> to vector<8x1xf32>
    %28 = tpu.reciprocal %27 {approx = true} : vector<8x1xf32> -> vector<8x1xf32>
    %29 = vector.broadcast %28 : vector<8x1xf32> to vector<8x8xf32>
    %30 = arith.mulf %25, %29 : vector<8x8xf32>
    %31 = arith.addf %16, %30 : vector<8x8xf32>
    %cst_17 = arith.constant dense<0.000000e+00> : vector<8x8xf32>
    %32 = tpu.matmul %30, %19, %cst_17 {dimension_numbers = #tpu.dot_dimension_numbers<[1], [0], [0], [1], [0, 0, 1, 1], [], []>} : vector<8x8xf32>, vector<8x8xf32>, vector<8x8xf32> -> vector<8x8xf32>
    %c0_18 = arith.constant 0 : index
    %c0_19 = arith.constant 0 : index
    %33 = vector.load %arg12[%c0_18, %c0_19] : memref<8x32xf32, #tpu.memory_space<vmem>>, vector<8x8xf32>
    tpu.vector_store %arg12[%c0_18, %c0_19], %32 {strides = array<i32>} : memref<8x32xf32, #tpu.memory_space<vmem>>, vector<8x8xf32>,
    %34 = vector.extract_strided_slice %11 {offsets = [0, 8], sizes = [8, 8], strides = [1, 1]} : vector<8x32xf32> to vector<8x8xf32>
    %35 = vector.extract_strided_slice %13 {offsets = [0, 8], sizes = [8, 8], strides = [1, 1]} : vector<8x32xf32> to vector<8x8xf32>
    %36 = vector.extract_strided_slice %15 {offsets = [0, 8], sizes = [8, 8], strides = [1, 1]} : vector<8x32xf32> to vector<8x8xf32>
    %cst_20 = arith.constant dense<0.000000e+00> : vector<8x8xf32>
    %37 = tpu.matmul %34, %35, %cst_20 {dimension_numbers = #tpu.dot_dimension_numbers<[1], [1], [0], [0], [0, 0, 1, 0], [], []>} : vector<8x8xf32>, vector<8x8xf32>, vector<8x8xf32> -> vector<8x8xf32>
    %cst_21 = arith.constant dense<0xFF800000> : vector<8xf32>
    %38 = vector.multi_reduction <maximumf>, %37, %cst_21 [1] : vector<8x8xf32> to vector<8xf32>
    %39 = vector.shape_cast %38 : vector<8xf32> to vector<8x1xf32>
    %40 = vector.broadcast %39 : vector<8x1xf32> to vector<8x8xf32>
    %41 = arith.subf %37, %40 : vector<8x8xf32>
    %42 = math.exp %41 : vector<8x8xf32>
    %cst_22 = arith.constant dense<0.000000e+00> : vector<8xf32>
    %43 = vector.multi_reduction <add>, %42, %cst_22 [1] : vector<8x8xf32> to vector<8xf32>
    %44 = vector.shape_cast %43 : vector<8xf32> to vector<8x1xf32>
    %45 = tpu.reciprocal %44 {approx = true} : vector<8x1xf32> -> vector<8x1xf32>
    %46 = vector.broadcast %45 : vector<8x1xf32> to vector<8x8xf32>
    %47 = arith.mulf %42, %46 : vector<8x8xf32>
    %48 = arith.addf %31, %47 : vector<8x8xf32>
    %cst_23 = arith.constant dense<0.000000e+00> : vector<8x8xf32>
    %49 = tpu.matmul %47, %36, %cst_23 {dimension_numbers = #tpu.dot_dimension_numbers<[1], [0], [0], [1], [0, 0, 1, 1], [], []>} : vector<8x8xf32>, vector<8x8xf32>, vector<8x8xf32> -> vector<8x8xf32>
    %c0_24 = arith.constant 0 : index
    %c8 = arith.constant 8 : index
    %50 = vector.load %arg12[%c0_24, %c8] : memref<8x32xf32, #tpu.memory_space<vmem>>, vector<8x8xf32>
    tpu.vector_store %arg12[%c0_24, %c8], %49 {strides = array<i32>} : memref<8x32xf32, #tpu.memory_space<vmem>>, vector<8x8xf32>,
    %51 = vector.extract_strided_slice %11 {offsets = [0, 16], sizes = [8, 8], strides = [1, 1]} : vector<8x32xf32> to vector<8x8xf32>
    %52 = vector.extract_strided_slice %13 {offsets = [0, 16], sizes = [8, 8], strides = [1, 1]} : vector<8x32xf32> to vector<8x8xf32>
    %53 = vector.extract_strided_slice %15 {offsets = [0, 16], sizes = [8, 8], strides = [1, 1]} : vector<8x32xf32> to vector<8x8xf32>
    %cst_25 = arith.constant dense<0.000000e+00> : vector<8x8xf32>
    %54 = tpu.matmul %51, %52, %cst_25 {dimension_numbers = #tpu.dot_dimension_numbers<[1], [1], [0], [0], [0, 0, 1, 0], [], []>} : vector<8x8xf32>, vector<8x8xf32>, vector<8x8xf32> -> vector<8x8xf32>
    %cst_26 = arith.constant dense<0xFF800000> : vector<8xf32>
    %55 = vector.multi_reduction <maximumf>, %54, %cst_26 [1] : vector<8x8xf32> to vector<8xf32>
    %56 = vector.shape_cast %55 : vector<8xf32> to vector<8x1xf32>
    %57 = vector.broadcast %56 : vector<8x1xf32> to vector<8x8xf32>
    %58 = arith.subf %54, %57 : vector<8x8xf32>
    %59 = math.exp %58 : vector<8x8xf32>
    %cst_27 = arith.constant dense<0.000000e+00> : vector<8xf32>
    %60 = vector.multi_reduction <add>, %59, %cst_27 [1] : vector<8x8xf32> to vector<8xf32>
    %61 = vector.shape_cast %60 : vector<8xf32> to vector<8x1xf32>
    %62 = tpu.reciprocal %61 {approx = true} : vector<8x1xf32> -> vector<8x1xf32>
    %63 = vector.broadcast %62 : vector<8x1xf32> to vector<8x8xf32>
    %64 = arith.mulf %59, %63 : vector<8x8xf32>
    %65 = arith.addf %48, %64 : vector<8x8xf32>
    %cst_28 = arith.constant dense<0.000000e+00> : vector<8x8xf32>
    %66 = tpu.matmul %64, %53, %cst_28 {dimension_numbers = #tpu.dot_dimension_numbers<[1], [0], [0], [1], [0, 0, 1, 1], [], []>} : vector<8x8xf32>, vector<8x8xf32>, vector<8x8xf32> -> vector<8x8xf32>
    %c0_29 = arith.constant 0 : index
    %c16 = arith.constant 16 : index
    %67 = vector.load %arg12[%c0_29, %c16] : memref<8x32xf32, #tpu.memory_space<vmem>>, vector<8x8xf32>
    tpu.vector_store %arg12[%c0_29, %c16], %66 {strides = array<i32>} : memref<8x32xf32, #tpu.memory_space<vmem>>, vector<8x8xf32>,
    %68 = vector.extract_strided_slice %11 {offsets = [0, 24], sizes = [8, 8], strides = [1, 1]} : vector<8x32xf32> to vector<8x8xf32>
    %69 = vector.extract_strided_slice %13 {offsets = [0, 24], sizes = [8, 8], strides = [1, 1]} : vector<8x32xf32> to vector<8x8xf32>
    %70 = vector.extract_strided_slice %15 {offsets = [0, 24], sizes = [8, 8], strides = [1, 1]} : vector<8x32xf32> to vector<8x8xf32>
    %cst_30 = arith.constant dense<0.000000e+00> : vector<8x8xf32>
    %71 = tpu.matmul %68, %69, %cst_30 {dimension_numbers = #tpu.dot_dimension_numbers<[1], [1], [0], [0], [0, 0, 1, 0], [], []>} : vector<8x8xf32>, vector<8x8xf32>, vector<8x8xf32> -> vector<8x8xf32>
    %cst_31 = arith.constant dense<0xFF800000> : vector<8xf32>
    %72 = vector.multi_reduction <maximumf>, %71, %cst_31 [1] : vector<8x8xf32> to vector<8xf32>
    %73 = vector.shape_cast %72 : vector<8xf32> to vector<8x1xf32>
    %74 = vector.broadcast %73 : vector<8x1xf32> to vector<8x8xf32>
    %75 = arith.subf %71, %74 : vector<8x8xf32>
    %76 = math.exp %75 : vector<8x8xf32>
    %cst_32 = arith.constant dense<0.000000e+00> : vector<8xf32>
    %77 = vector.multi_reduction <add>, %76, %cst_32 [1] : vector<8x8xf32> to vector<8xf32>
    %78 = vector.shape_cast %77 : vector<8xf32> to vector<8x1xf32>
    %79 = tpu.reciprocal %78 {approx = true} : vector<8x1xf32> -> vector<8x1xf32>
    %80 = vector.broadcast %79 : vector<8x1xf32> to vector<8x8xf32>
    %81 = arith.mulf %76, %80 : vector<8x8xf32>
    %82 = arith.addf %65, %81 : vector<8x8xf32>
    %cst_33 = arith.constant dense<0.000000e+00> : vector<8x8xf32>
    %83 = tpu.matmul %81, %70, %cst_33 {dimension_numbers = #tpu.dot_dimension_numbers<[1], [0], [0], [1], [0, 0, 1, 1], [], []>} : vector<8x8xf32>, vector<8x8xf32>, vector<8x8xf32> -> vector<8x8xf32>
    %c0_34 = arith.constant 0 : index
    %c24 = arith.constant 24 : index
    %84 = vector.load %arg12[%c0_34, %c24] : memref<8x32xf32, #tpu.memory_space<vmem>>, vector<8x8xf32>
    tpu.vector_store %arg12[%c0_34, %c24], %83 {strides = array<i32>} : memref<8x32xf32, #tpu.memory_space<vmem>>, vector<8x8xf32>,
    %cst_35 = arith.constant 2.500000e-01 : f32
    %85 = vector.broadcast %cst_35 : f32 to vector<8x8xf32>
    %86 = arith.mulf %82, %85 : vector<8x8xf32>
    %c0_36 = arith.constant 0 : index
    %c0_37 = arith.constant 0 : index
    %c0_38 = arith.constant 0 : index
    %87 = vector.load %arg10[%c0_36, %c0_37, %c0_38] : memref<1x8x8xf32, #tpu.memory_space<vmem>>, vector<1x8x8xf32>
    %88 = vector.shape_cast %87 : vector<1x8x8xf32> to vector<8x8xf32>
    %89 = vector.shape_cast %86 : vector<8x8xf32> to vector<1x8x8xf32>
    tpu.vector_store %arg10[%c0_36, %c0_37, %c0_38], %89 {strides = array<i32>} : memref<1x8x8xf32, #tpu.memory_space<vmem>>, vector<1x8x8xf32>,
    %c0_39 = arith.constant 0 : index
    %c0_40 = arith.constant 0 : index
    %90 = vector.load %arg12[%c0_39, %c0_40] : memref<8x32xf32, #tpu.memory_space<vmem>>, vector<8x32xf32>
    %c0_41 = arith.constant 0 : index
    %c0_42 = arith.constant 0 : index
    %91 = vector.load %arg7[%c0_41, %c0_42] : memref<32x32xf32, #tpu.memory_space<vmem>>, vector<32x32xf32>
    %cst_43 = arith.constant dense<0.000000e+00> : vector<8x32xf32>
    %92 = tpu.matmul %90, %91, %cst_43 {dimension_numbers = #tpu.dot_dimension_numbers<[1], [0], [0], [1], [0, 0, 1, 1], [], []>} : vector<8x32xf32>, vector<32x32xf32>, vector<8x32xf32> -> vector<8x32xf32>
    %c0_44 = arith.constant 0 : index
    %c0_45 = arith.constant 0 : index
    %93 = vector.load %arg8[%c0_44, %c0_45] : memref<1x32xf32, #tpu.memory_space<vmem>>, vector<1x32xf32>
    %94 = vector.broadcast %93 : vector<1x32xf32> to vector<8x32xf32>
    %95 = arith.addf %92, %94 : vector<8x32xf32>
    %c0_46 = arith.constant 0 : index
    %c0_47 = arith.constant 0 : index
    %c0_48 = arith.constant 0 : index
    %96 = vector.load %arg9[%c0_46, %c0_47, %c0_48] : memref<1x8x32xf32, #tpu.memory_space<vmem>>, vector<1x8x32xf32>
    %97 = vector.shape_cast %96 : vector<1x8x32xf32> to vector<8x32xf32>
    %98 = vector.shape_cast %95 : vector<8x32xf32> to vector<1x8x32xf32>
    tpu.vector_store %arg9[%c0_46, %c0_47, %c0_48], %98 {strides = array<i32>} : memref<1x8x32xf32, #tpu.memory_space<vmem>>, vector<1x8x32xf32>,
    return
  }
  func.func @transform_0(%arg0: i32, %arg1: i32) -> (i32, i32, i32) {
    %c0_i32 = arith.constant 0 : i32
    %c0_i32_0 = arith.constant 0 : i32
    return %arg0, %arg1, %c0_i32 : i32, i32, i32
  }
  func.func @transform_1(%arg0: i32, %arg1: i32) -> (i32, i32, i32) {
    %c0_i32 = arith.constant 0 : i32
    %c0_i32_0 = arith.constant 0 : i32
    %c0_i32_1 = arith.constant 0 : i32
    return %arg0, %c0_i32, %c0_i32_0 : i32, i32, i32
  }
  func.func @transform_2(%arg0: i32, %arg1: i32) -> (i32, i32, i32) {
    %c0_i32 = arith.constant 0 : i32
    %c0_i32_0 = arith.constant 0 : i32
    %c0_i32_1 = arith.constant 0 : i32
    return %arg0, %c0_i32, %c0_i32_0 : i32, i32, i32
  }
  func.func @transform_3(%arg0: i32, %arg1: i32) -> (i32, i32) {
    %c0_i32 = arith.constant 0 : i32
    %c0_i32_0 = arith.constant 0 : i32
    %c0_i32_1 = arith.constant 0 : i32
    return %c0_i32, %c0_i32_0 : i32, i32
  }
  func.func @transform_4(%arg0: i32, %arg1: i32) -> (i32, i32) {
    %c0_i32 = arith.constant 0 : i32
    %c0_i32_0 = arith.constant 0 : i32
    %c0_i32_1 = arith.constant 0 : i32
    return %c0_i32, %c0_i32_0 : i32, i32
  }
  func.func @transform_5(%arg0: i32, %arg1: i32) -> (i32, i32) {
    %c0_i32 = arith.constant 0 : i32
    %c0_i32_0 = arith.constant 0 : i32
    %c0_i32_1 = arith.constant 0 : i32
    return %c0_i32, %c0_i32_0 : i32, i32
  }
  func.func @transform_6(%arg0: i32, %arg1: i32) -> (i32, i32) {
    %c0_i32 = arith.constant 0 : i32
    %c0_i32_0 = arith.constant 0 : i32
    %c0_i32_1 = arith.constant 0 : i32
    return %c0_i32, %c0_i32_0 : i32, i32
  }
  func.func @transform_7(%arg0: i32, %arg1: i32) -> (i32, i32, i32) {
    %c0_i32 = arith.constant 0 : i32
    %c0_i32_0 = arith.constant 0 : i32
    return %arg0, %arg1, %c0_i32 : i32, i32, i32
  }
  func.func @transform_8(%arg0: i32, %arg1: i32) -> (i32, i32, i32) {
    %c0_i32 = arith.constant 0 : i32
    %c0_i32_0 = arith.constant 0 : i32
    return %arg0, %arg1, %c0_i32 : i32, i32, i32
  }
}

</mosaic_0001>

<bundles_post_ra>
// kernel: tpu_custom_call.1
= control target key start
LH: loop header
LB: loop body
LE: loop exit
PB: predicated region body
PF: predicated region fallthrough
CT: control target
= control target key end

     0   :  { %s2844_s0 = inlined_call_operand.hbm [shape: f32[2,8,32], index: 0, kind: input, shape index: {}]   ;;  %s2845_s1 = inlined_call_operand.hbm [shape: f32[2,8,32], index: 1, kind: input, shape index: {}]   ;;  %s2846_s2 = inlined_call_operand.hbm [shape: f32[2,8,32], index: 2, kind: input, shape index: {}]   ;;  %s2847_s3 = inlined_call_operand.hbm [shape: f32[32,96], index: 3, kind: input, shape index: {}]   ;;  %s2848_s4 = inlined_call_operand.vmem [shape: f32[1,96], index: 4, kind: input, shape index: {}]   ;;  %s2849_s5 = inlined_call_operand.hbm [shape: f32[32,32], index: 5, kind: input, shape index: {}]   ;;  %s2850_s6 = inlined_call_operand.vmem [shape: f32[1,32], index: 6, kind: input, shape index: {}]   ;;  %s2851_s7 = inlined_call_operand.hbm [shape: f32[2,8,32], index: 7, kind: output, shape index: {0}]   ;;  %s2852_s8 = inlined_call_operand.hbm [shape: f32[2,8,8], index: 8, kind: output, shape index: {1}]  }
   0x1   :  { %2873 = sst [smem:[#allocation27_spill]] %s2845_s1 }
   0x2   :  { %2874 = sst [smem:[#allocation28_spill]] %s2847_s3 }
   0x3   :  { %2875 = sst [smem:[#allocation29_spill]] %s2849_s5 }
   0x4   :  { %14 = vsyncpa [#allocation5], 0 }
   0x5   :  { %16 = vsyncpa [#allocation5 + $0x1], 0 }
   0x6   :  { %17 = vsyncpa [#allocation8], 0 }
   0x7   :  { %19 = vsyncpa [#allocation8 + $0x1], 0 }
   0x8   :  { %20 = vsyncpa [#allocation11], 0 }
   0x9   :  { %21 = vsyncpa [#allocation6], 0 }
   0xa   :  { %23 = vsyncpa [#allocation6 + $0x1], 0 }
   0xb   :  { %24 = vsyncpa [#allocation15], 0 }
   0xc   :  { %26 = vsyncpa [#allocation15 + $0x1], 0  ;;  %s2389_s27 = smov 0   ;;  %s2391_s28 = smov 0  }
   0xd   :  { %s2393_s29 = smov 0   ;;  %s2395_s30 = smov 0  }
   0xe   :  { %s2397_s9 = smov 0   ;;  %s2399_s10 = smov 0  }
   0xf LB: > { %2876 = sst [smem:[#allocation21_spill]] %s2302_s27  ;;  %s2420_s11 = sadd.s32 4294967295, %s2322_s10   ;;  %s2322_s10 = sphi %s2399_s10, %s32_s10   ;;  %s2318_s9 = sphi %s2397_s9, %s2914_s9   ;;  %s2314_s30 = sphi %s2395_s30, %s2913_s30   ;;  %s2310_s29 = sphi %s2393_s29, %s2917_s29   ;;  %s2306_s28 = sphi %s2391_s28, %s2916_s28   ;;  %s2302_s27 = sphi %s2389_s27, %s2915_s27  }
  0x10   : > { %2877 = sst [smem:[#allocation22_spill]] %s2318_s9  ;;  %s1719_s12 = sadd.s32 4294967294, %s2322_s10  }
  0x11   : > { %2878 = sst [smem:[#allocation23_spill]] %s2322_s10  ;;  %p66_p0 = scmp.ne.s32.totalorder %s2306_s28, %s2302_s27 }
  0x12   : > { %p2853_p1 = scmp.eq.s32.totalorder %s2420_s11, 0  ;;  %p234_p3 = scmp.eq.s32.totalorder %s1719_s12, 1 }
  0x13   : > { %p1720_p5 = scmp.ge.s32.totalorder %s2322_s10, 1  ;;  %p269_p7 = scmp.lt.s32.totalorder %s2322_s10, 3 }
  0x14   : > { %p2429_p4 = por %p2853_p1, %p66_p0  ;;  %p2434_p6 = por %p234_p3, %p66_p0 }
  0x15   : > { %p2439_p8 = pnand %p1720_p5, %p269_p7  ;;  %s2324_s16 = smov [#allocation10]  }
  0x16   : > { %s2879_s13 = scalar_select %p2429_p4, 1, 0 }
  0x17   : > { %s2880_s14 = scalar_select %p2434_p6, 1, 0 }
  0x18   : > { %s2882_s15 = scalar_select %p2439_p8, 1, 0 }
  0x19   : > { %2881 = sst [smem:[#allocation24_spill]] %s2880_s14  ;;  %s281_s17 = sshll.u32 %s2324_s16, 4  ;;  %s282_s17 = int_to_ptr.vmem [resolvable:$true] %s281_s17 }
  0x1a   : > { %p1925_p9 = pneg %p2439_p8  ;;  %s44_s19 = sadd.s32 1, %s2318_s9 }
  0x1b   : > { %s2884_s3 = sld [smem:[#allocation28_spill]] }
  0x1c   : > { %p2448_p11 = pnand %p1925_p9, %p2853_p1 }
  0x1e   : > { %s2883_s18 = scalar_select %p2448_p11, 1, 0 }
  0x1f   : > { %p2865_p13 = pneg %p2448_p11 }
  0x21   : > { %s2054_s22 = scalar_lea.hbm %s2884_s3, 512 }
  0x22   : > { %p2055_p12 = scmp.ne.s32.totalorder %s2884_s3, %s2054_s22  ;;  %p2061_p5 = scmp.lt.u32.totalorder %s2054_s22, %s2884_s3 }
  0x24   : > { %p2057_p0 = pnand %p2865_p13, %p2055_p12 }
  0x26   : > { %p2058_p3 = pneg %p2057_p0 }
  0x28   : > { %p2063_p7 = pnand %p2061_p5, %p2058_p3 }
  0x2a   : > { %2066 = shalt.err (!%p2063_p7)
}
  0x2b   : > { %s2067_s12 = scalar_lea.vmem %s282_s17, 512  ;;  %p2075_p2 = scmp.lt.s32.totalorder %s282_s17, %s282_s17 }
  0x2c   : > { %p2068_p9 = scmp.ne.s32.totalorder %s282_s17, %s2067_s12  ;;  %p2076_p6 = scmp.lt.s32.totalorder %s2067_s12, %s2067_s12 }
  0x2e   : > { %p2070_p10 = pnand %p2068_p9, %p2865_p13  ;;  %p2077_p4 = por %p2076_p6, %p2075_p2 }
  0x30   : > { %p2071_p1 = pneg %p2070_p10 }
  0x32   : > { %p2078_p8 = pnand %p2077_p4, %p2071_p1 }
  0x34   : > { %2081 = shalt.err (!%p2078_p8)
}
  0x35   : > { %s2856_s16 = smov 128   ;;  %s2857_s20 = smov 8  }
  0x36   : > { %1928 = dma.hbm_to_vmem [thread:$0]  (!%p2448_p11), %s2884_s3, 512, %s282_s17, [#allocation11], %s2856_s16, %s2856_s16, %s2857_s20  }
  0x37   : > { %p46_p1 = scmp.ge.s32.totalorder %s44_s19, 2  ;;  %s53_s23 = sadd.s32 1, %s2310_s29 }
  0x38   : > { %p60_p2 = scmp.ne.s32.totalorder %s2310_s29, %s2306_s28  ;;  %p61_p4 = scmp.eq.s32.totalorder %s2322_s10, 0 }
  0x39   : > { %s2919_s19 = smov (%p46_p1, %s44_s19), 0  ;;  %p2886_p8 = scmp.eq.s32.totalorder %s2420_s11, 1 }
  0x3a   : > { %2885 = sst [smem:[#allocation25_spill]] %s2919_s19  ;;  %p62_p6 = por %p61_p4, %p60_p2 }
  0x3b   : > { %p2486_p10 = por %p2886_p8, %p60_p2  ;;  %s48_s25 = ssub.s32 %s2318_s9, %s2919_s19 }
  0x3c   : > { %p1951_p12 = scmp.lt.s32.totalorder %s2322_s10, 2  ;;  %p51_p0 = scmp.eq.s32.totalorder %s48_s25, 0 }
  0x3d   : > { %s2887_s24 = scalar_select %p2486_p10, 1, 0 }
  0x3e   : > { %s2858_s26 = sand.u32 1, %s2310_s29   ;;  %s2499_s12 = sshll.u32 %s2318_s9, 7 }
  0x3f   : > { %s2496_s17 = sshll.u32 %s2858_s26, 3  ;;  %p2504_p3 = pnand %p1951_p12, %p62_p6 }
  0x40   : > { %s2502_s21 = scalar_select %p51_p0, %s2310_s29, %s53_s23  }
  0x41   : > { %s2889_s22 = scalar_select %p2504_p3, 1, 0 }
  0x42   : > { %2888 = sst [smem:[#allocation26_spill]] %s2502_s21  ;;  %s333_s16 = sand.u32 1, %s2322_s10  }
  0x43   : > { %s2890_s1 = sld [smem:[#allocation27_spill]]  ;;  %s337_s26 = scalar_lea.vmem [#allocation7], %s2496_s17 }
  0x44   : > { %s344_s19 = sshll.u32 %s337_s26, 4  ;;  %s2327_s23 = smov [#allocation12]   ;;  %s2516_s19 = int_to_ptr.vmem [resolvable:$true] %s344_s19 }
  0x45   : > { %s2518_s9 = sshll.u32 %s2327_s23, 4  ;;  %s2520_s21 = scalar_lea.sflag [#allocation8], %s333_s16  ;;  %s298_s9 = int_to_ptr.vmem [resolvable:$true] %s2518_s9 }
  0x46   : > { %p2526_p7 = pneg %p2504_p3 }
  0x48   : > { %s2891_s3 = scalar_select %p2526_p7, 1, 0 }
  0x49   : > { %s2513_s25 = scalar_lea.hbm %s2890_s1, %s2499_s12  ;;  %s2087_s10 = scalar_lea.hbm %s2890_s1, 256 }
  0x4a   : > { %s2082_s14 = scalar_lea.hbm %s2513_s25, 128  ;;  %p2088_p2 = scmp.lt.u32.totalorder %s2513_s25, %s2890_s1 }
  0x4b   : > { %p2083_p5 = scmp.ne.s32.totalorder %s2513_s25, %s2082_s14  ;;  %p2089_p4 = scmp.lt.u32.totalorder %s2087_s10, %s2082_s14 }
  0x4c   : > { %p2091_p8 = scmp.lt.u32.totalorder %s2082_s14, %s2513_s25 }
  0x4d   : > { %p2085_p9 = pnand %p2526_p7, %p2083_p5  ;;  %p2090_p6 = por %p2089_p4, %p2088_p2 }
  0x4f   : > { %p2086_p1 = pneg %p2085_p9  ;;  %p2092_p12 = por %p2091_p8, %p2090_p6 }
  0x51   : > { %p2093_p0 = pnand %p2092_p12, %p2086_p1 }
  0x53   : > { %2096 = shalt.err (!%p2093_p0)
}
  0x54   : > { %s2097_s16 = scalar_lea.vmem %s2516_s19, 128  ;;  %s2328_s20 = smov [#allocation7]  }
  0x55   : > { %p2098_p5 = scmp.ne.s32.totalorder %s2516_s19, %s2097_s16  ;;  %s2102_s26 = sshll.u32 %s2328_s20, 4  ;;  %s2103_s26 = int_to_ptr.vmem [resolvable:$false] %s2102_s26 }
  0x56   : > { %s2104_s27 = scalar_lea.vmem %s2103_s26, 256  ;;  %p2105_p10 = scmp.lt.s32.totalorder %s2516_s19, %s2103_s26 }
  0x57   : > { %p2100_p9 = pnand %p2098_p5, %p2526_p7  ;;  %p2106_p11 = scmp.lt.s32.totalorder %s2104_s27, %s2097_s16 }
  0x59   : > { %p2101_p13 = pneg %p2100_p9  ;;  %p2107_p2 = por %p2106_p11, %p2105_p10 }
  0x5b   : > { %p2108_p4 = pnand %p2107_p2, %p2101_p13 }
  0x5d   : > { %2111 = shalt.err (!%p2108_p4)
}
  0x5e   : > { %1938 = dma.hbm_to_vmem [thread:$0]  (!%p2504_p3), %s2513_s25, 128, %s2516_s19, %s2520_s21  }
  0x5f   : > { %s2892_s5 = sld [smem:[#allocation29_spill]]  ;;  %p2893_p11 = scmp.ne.s32.totalorder %s2883_s18, 0 }
  0x61   : > { %p2894_p13 = pneg %p2893_p11 }
  0x65   : > { %s2112_s23 = scalar_lea.hbm %s2892_s5, 512 }
  0x66   : > { %p2113_p1 = scmp.ne.s32.totalorder %s2892_s5, %s2112_s23  ;;  %p2119_p8 = scmp.lt.u32.totalorder %s2112_s23, %s2892_s5 }
  0x68   : > { %p2115_p10 = pnand %p2113_p1, %p2894_p13 }
  0x6a   : > { %p2116_p6 = pneg %p2115_p10 }
  0x6c   : > { %p2121_p12 = pnand %p2119_p8, %p2116_p6 }
  0x6e   : > { %2124 = shalt.err (!%p2121_p12)
}
  0x6f   : > { %s2125_s19 = scalar_lea.vmem %s298_s9, 512  ;;  %p2895_p5 = pmov %p2894_p13 }
  0x70   : > { %p2126_p0 = scmp.ne.s32.totalorder %s298_s9, %s2125_s19  ;;  %p2133_p4 = scmp.lt.s32.totalorder %s298_s9, %s298_s9 }
  0x71   : > { %p2134_p3 = scmp.lt.s32.totalorder %s2125_s19, %s2125_s19 }
  0x72   : > { %p2128_p9 = pnand %p2126_p0, %p2895_p5 }
  0x73   : > { %p2135_p7 = por %p2134_p3, %p2133_p4 }
  0x74   : > { %p2129_p2 = pneg %p2128_p9 }
  0x76   : > { %p2136_p1 = pnand %p2135_p7, %p2129_p2 }
  0x78   : > { %2139 = shalt.err (!%p2136_p1)
}
  0x79   : > { %s2896_s1 = smov 8   ;;  %s2897_s25 = smov 128  }
  0x7a   : > { %1931 = dma.hbm_to_vmem [thread:$0]  (!%p2893_p11), %s2892_s5, 512, %s298_s9, [#allocation11], %s2897_s25, %s2897_s25, %s2896_s1  }
  0x7b   : > { %s2578_s20 = scalar_lea.hbm %s2844_s0, %s2499_s12  ;;  %s318_s18 = scalar_lea.vmem [#allocation4], %s2496_s17 }
  0x7c   : > { %s326_s16 = sshll.u32 %s318_s18, 4  ;;  %s2587_s27 = scalar_lea.hbm %s2846_s2, %s2499_s12  ;;  %s2581_s16 = int_to_ptr.vmem [resolvable:$true] %s326_s16 }
  0x7d   : > { %s2898_s10 = sand.u32 1, %s2310_s29   ;;  %s2140_s1 = scalar_lea.hbm %s2578_s20, 128 }
  0x7e   : > { %s315_s9 = scalar_lea.sflag [#allocation5], %s2898_s10  ;;  %p2141_p3 = scmp.ne.s32.totalorder %s2578_s20, %s2140_s1 }
  0x7f   : > { %p2899_p7 = scmp.ne.s32.totalorder %s2891_s3, 0  ;;  %s2145_s23 = scalar_lea.hbm %s2844_s0, 256 }
  0x80   : > { %p2146_p10 = scmp.lt.u32.totalorder %s2578_s20, %s2844_s0  ;;  %p2147_p6 = scmp.lt.u32.totalorder %s2145_s23, %s2140_s1 }
  0x81   : > { %p2143_p11 = pnand %p2141_p3, %p2899_p7  ;;  %p2149_p12 = scmp.lt.u32.totalorder %s2140_s1, %s2578_s20 }
  0x82   : > { %p2148_p8 = por %p2147_p6, %p2146_p10 }
  0x83   : > { %p2144_p13 = pneg %p2143_p11 }
  0x84   : > { %p2150_p0 = por %p2149_p12, %p2148_p8 }
  0x86   : > { %p2151_p5 = pnand %p2150_p0, %p2144_p13 }
  0x88   : > { %2154 = shalt.err (!%p2151_p5)
}
  0x89   : > { %s2155_s12 = scalar_lea.vmem %s2581_s16, 128  ;;  %s2329_s26 = smov [#allocation4]  }
  0x8a   : > { %p2156_p9 = scmp.ne.s32.totalorder %s2581_s16, %s2155_s12  ;;  %s2160_s19 = sshll.u32 %s2329_s26, 4  ;;  %s2161_s19 = int_to_ptr.vmem [resolvable:$false] %s2160_s19 }
  0x8b   : > { %s2162_s5 = scalar_lea.vmem %s2161_s19, 256  ;;  %p2163_p1 = scmp.lt.s32.totalorder %s2581_s16, %s2161_s19 }
  0x8c   : > { %p2158_p2 = pnand %p2156_p9, %p2899_p7  ;;  %p2164_p3 = scmp.lt.s32.totalorder %s2162_s5, %s2155_s12 }
  0x8e   : > { %p2159_p4 = pneg %p2158_p2  ;;  %p2165_p11 = por %p2164_p3, %p2163_p1 }
  0x90   : > { %p2166_p10 = pnand %p2165_p11, %p2159_p4 }
  0x92   : > { %2169 = shalt.err (!%p2166_p10)
}
  0x93   : > { %p2900_p13 = scmp.ne.s32.totalorder %s2889_s22, 0  ;;  %s355_s10 = scalar_lea.vmem [#allocation9], %s2496_s17 }
  0x94   : > { %s362_s1 = sshll.u32 %s355_s10, 4  ;;  %s2170_s25 = scalar_lea.hbm %s2587_s27, 128  ;;  %s363_s1 = int_to_ptr.vmem [resolvable:$true] %s362_s1 }
  0x95   : > { %1935 = dma.hbm_to_vmem [thread:$0]  (!%p2900_p13), %s2578_s20, 128, %s2581_s16, %s315_s9  }
  0x96   : > { %p2171_p6 = scmp.ne.s32.totalorder %s2587_s27, %s2170_s25  ;;  %s2175_s18 = scalar_lea.hbm %s2846_s2, 256 }
  0x97   : > { %p2176_p0 = scmp.lt.u32.totalorder %s2587_s27, %s2846_s2  ;;  %p2177_p5 = scmp.lt.u32.totalorder %s2175_s18, %s2170_s25 }
  0x98   : > { %p2173_p8 = pnand %p2171_p6, %p2899_p7  ;;  %p2179_p2 = scmp.lt.u32.totalorder %s2170_s25, %s2587_s27 }
  0x99   : > { %p2178_p9 = por %p2177_p5, %p2176_p0 }
  0x9a   : > { %p2174_p12 = pneg %p2173_p8 }
  0x9b   : > { %p2180_p4 = por %p2179_p2, %p2178_p9 }
  0x9d   : > { %p2181_p1 = pnand %p2180_p4, %p2174_p12 }
  0x9f   : > { %2184 = shalt.err (!%p2181_p1)
}
  0xa0   : > { %s2185_s17 = scalar_lea.vmem %s363_s1, 128  ;;  %s2330_s20 = smov [#allocation9]  }
  0xa1   : > { %p2186_p3 = scmp.ne.s32.totalorder %s363_s1, %s2185_s17  ;;  %s2190_s16 = sshll.u32 %s2330_s20, 4  ;;  %s2191_s16 = int_to_ptr.vmem [resolvable:$false] %s2190_s16 }
  0xa2   : > { %s2192_s9 = scalar_lea.vmem %s2191_s16, 256  ;;  %p2193_p6 = scmp.lt.s32.totalorder %s363_s1, %s2191_s16 }
  0xa3   : > { %p2188_p11 = pnand %p2186_p3, %p2899_p7  ;;  %p2194_p8 = scmp.lt.s32.totalorder %s2192_s9, %s2185_s17 }
  0xa5   : > { %p2189_p10 = pneg %p2188_p11  ;;  %p2195_p13 = por %p2194_p8, %p2193_p6 }
  0xa7   : > { %p2196_p0 = pnand %p2195_p13, %p2189_p10 }
  0xa9   : > { %2199 = shalt.err (!%p2196_p0)
}
  0xaa   : > { %p2901_p5 = scmp.ne.s32.totalorder %s2889_s22, 0  ;;  %p2902_p12 = scmp.ne.s32.totalorder %s2882_s15, 0 }
  0xab   : > { %s2634_s3 = sand.u32 (!%p2902_p12), 1, %s2306_s28   ;;  %p2903_p7 = scmp.ne.s32.totalorder (!%p2902_p12), %s2879_s13, 0 }
  0xac   : > { %1941 = dma.hbm_to_vmem [thread:$0]  (!%p2901_p5), %s2587_s27, 128, %s363_s1, %s2520_s21  }
  0xad   : > { %371 = sbr.rel (%p2902_p12) target bundleno = 2183 (0x887), region = 48  ;;  %s2637_s19 = sshll.u32 (!%p2902_p12), %s2634_s3, 3 }
  0xae   : > { %s374_s5 = scalar_lea.sflag (!%p2902_p12), [#allocation5], %s2634_s3  ;;  %s377_s10 = scalar_lea.vmem (!%p2902_p12), [#allocation4], %s2637_s19 }
  0xb4   : > { %2281 = dma.done.wait (%p2903_p7), %s374_s5, 128  }
  0xb5   : > { %2283 = vsyncadd (%p2903_p7), %s374_s5, 4294967168  ;;  %s382_s15 = sand.u32 1, %s2420_s11   ;;  %s386_s22 = scalar_lea.vmem [#allocation7], %s2637_s19 }
  0xb6   : > { %s383_s21 = scalar_lea.sflag [#allocation8], %s382_s15 }
  0xb7   : > { %2285 = dma.done.wait (%p2903_p7), %s383_s21, 256  }
  0xb8   : > { %2287 = vsyncadd (%p2903_p7), %s383_s21, 4294967040  ;;  %s395_s27 = scalar_lea.vmem [#allocation9], %s2637_s19  ;;  %p2904_p13 = scmp.eq.s32.totalorder %s2420_s11, 0 }
  0xba   : > { %2289 = dma.done.wait (%p2904_p13), [#allocation11], 1024   ;;  %p2905_p9 = pmov %p2904_p13 }
  0xbb   : > { %v2331_v0 = vmov 0.0|0.0   ;;  %vm2332_vm0 = vmmov 0   ;;  %v2333_v1 = vmov 0.0   ;;  %v457_v2 = vld [vmem:[#allocation10] sm:$0xff]  ;;  %v458_v3 = vld [vmem:[#allocation10 + $0x8] sm:$0xff]  ;;  %v459_v4 = vld [vmem:[#allocation10 + $0x10] sm:$0xff] }
  0xbc   : > { %2291 = vsyncadd (%p2905_p9), [#allocation11], 4294966272  ;;  %1883 = vmatprep.subr.bf16.mxu0 %v2331_v0  ;;  %1889 = vmatprep.subr.bf16.mxu1 %v2331_v0  ;;  %v2018_v5 = vpack.i.bf16 %v458_v3, %v457_v2  ;;  %v460_v6 = vld [vmem:[#allocation10 + $0x18] sm:$0xff]  ;;  %v1896_v7 = vpack.c.bf16 %v458_v3, %v457_v2  ;;  %s2334_s11 = smov 96   ;;  %s2335_s25 = smov 64   ;;  %v455_v22 = vld [vmem:[%s386_s22] sm:$0xff] }
  0xbd   : > { %1807 = vmatprep.mubr.msk.f32.mxu0 %vm2332_vm0, %v2333_v1  ;;  %1818 = vmatprep.mubr.msk.f32.mxu1 %vm2332_vm0, %v2333_v1  ;;  %v2023_v8 = vpack.i.bf16 %v460_v6, %v459_v4  ;;  %v1899_v9 = vpack.c.bf16 %v460_v6, %v459_v4  ;;  %v2665_v10 = vld [vmem:[%s2848_s4] ss:$0 sm:$0xff]  ;;  %vm486_vm1 = vcmask 261120   ;;  %vm741_vm2 = vcmask 64512   ;;  %s2336_s14 = smov 120   ;;  %s2337_s23 = smov 112  }
  0xbe   : > { %2019 = vrot.lane.b32.xlu0 %v2018_v5, %s2334_s11  ;;  %2029 = vrot.lane.b32.xlu1 %v2018_v5, %s2335_s25  ;;  %v651_v28 = vld [vmem:[%s377_s10] sm:$0xff]  ;;  %s2338_s18 = smov 104   ;;  %s450_s12 = scalar_lea.vmem [#allocation14], %s2637_s19  ;;  %vm1075_vm3 = vcmask 130112   ;;  %vm1247_vm4 = vcmask 195712   ;;  %vm1419_vm5 = vcmask 261312  }
  0xbf   : > { %v456_v29 = vld [vmem:[%s395_s27] sm:$0xff]  ;;  %s2339_s26 = smov 8   ;;  %s2340_s17 = smov 16  }
  0xc0   : > { %s2341_s20 = smov 24   ;;  %s1759_s16 = sshll.u32 %s2314_s30, 7 }
  0xc1   : > { %s2763_s10 = scalar_lea.hbm %s2852_s8, %s1759_s16  ;;  %s1543_s15 = sshll.u32 %s450_s12, 4  ;;  %s1544_s15 = int_to_ptr.vmem [resolvable:$true] %s1543_s15 }
  0xc2   : > { %2024 = vrot.lane.b32.xlu0 %v2023_v8, %s2334_s11  ;;  %2034 = vrot.lane.b32.xlu1 %v2023_v8, %s2335_s25  ;;  %s1515_s21 = scalar_lea.sflag [#allocation15], %s2634_s3  ;;  %s2200_s22 = scalar_lea.vmem %s1544_s15, 128 }
  0xc3   : > { %p2201_p2 = scmp.ne.s32.totalorder %s1544_s15, %s2200_s22  ;;  %p2906_p4 = scmp.ne.s32.totalorder %s2887_s24, 0 }
  0xc4   : > { %s2342_s27 = smov [#allocation14]  }
  0xc5   : > { %p2202_p1 = pnand %p2201_p2, %p2906_p4 }
  0xc6   : > { %483 = vrot.lane.b32.xlu0 %v2665_v10, %s2334_s11  ;;  %s2204_s11 = sshll.u32 %s2342_s27, 4  ;;  %s2205_s11 = int_to_ptr.vmem [resolvable:$false] %s2204_s11 }
  0xc7   : > { %p2203_p3 = pneg %p2202_p1  ;;  %s2206_s13 = scalar_lea.vmem %s2205_s11, 256 }
  0xc8   : > { %p2207_p11 = scmp.lt.s32.totalorder %s1544_s15, %s2205_s11  ;;  %p2208_p10 = scmp.lt.s32.totalorder %s2206_s13, %s2200_s22 }
  0xca   : > { %p2209_p6 = por %p2208_p10, %p2207_p11 }
  0xcc   : > { %p2210_p8 = pnand %p2209_p6, %p2203_p3 }
 0x130   : > { %v2020_v11 = vpop.permute.xlu0 %2019  ;;  %v2030_v19 = vpop.permute.xlu1 %2029 }
 0x131   : > { %v2022_v12 = vunpack.i.h.bf16 %v2020_v11  ;;  %v2021_v13 = vunpack.i.l.bf16 %v2020_v11  ;;  %v2032_v20 = vunpack.i.h.bf16 %v2030_v19  ;;  %v2031_v21 = vunpack.i.l.bf16 %v2030_v19 }
 0x133   : > { %v1884_v14 = vpack.c.bf16 %v2022_v12, %v2021_v13  ;;  %v1890_v23 = vpack.c.bf16 %v2032_v20, %v2031_v21 }
 0x134   : > { %v2025_v15 = vpop.permute.xlu0 %2024  ;;  %v2035_v24 = vpop.permute.xlu1 %2034 }
 0x135   : > { %v2027_v16 = vunpack.i.h.bf16 %v2025_v15  ;;  %v2026_v17 = vunpack.i.l.bf16 %v2025_v15  ;;  %1885 = vmatpush3.bf16.msra.mxu0 %v1884_v14  ;;  %v2037_v25 = vunpack.i.h.bf16 %v2035_v24  ;;  %v2036_v26 = vunpack.i.l.bf16 %v2035_v24  ;;  %1891 = vmatpush3.bf16.msra.mxu1 %v1890_v23 }
 0x136   : > { %1886 = vmatprep.subr.bf16.mxu0 %v2331_v0  ;;  %1892 = vmatprep.subr.bf16.mxu1 %v2331_v0 }
 0x137   : > { %v1887_v18 = vpack.c.bf16 %v2027_v16, %v2026_v17  ;;  %v1893_v27 = vpack.c.bf16 %v2037_v25, %v2036_v26 }
 0x138   : > { %v484_v30 = vpop.permute.xlu0 %483 }
 0x139   : > { %1888 = vmatpush3.bf16.msra.mxu0 %v1887_v18  ;;  %1894 = vmatpush3.bf16.msra.mxu1 %v1893_v27 }
 0x13a   : > { %1895 = vmatprep.subr.bf16.mxu0 %v2331_v0  ;;  %1832 = vmatprep.subr.mxu1 %v2333_v1 }
 0x13c   : > { %1808 = vmatmul.mubr.msk.f32.vlgmr.msra.gmra.mrb[0].mxu0 %vm486_vm1, %v455_v22  ;;  %1819 = vmatmul.mubr.msk.f32.vlgmr.msra.gmra.mrb[0].mxu1 %vm486_vm1, %v456_v29 }
 0x13d   : > { %1897 = vmatpush3.bf16.msra.mxu0 %v1896_v7  ;;  %1829 = vmatprep.mubr.msk.f32.mxu0 %vm2332_vm0, %v2333_v1 }
 0x13e   : > { %1898 = vmatprep.subr.bf16.mxu0 %v2331_v0  ;;  %1834 = vmatprep.mubr.msk.f32.mxu1 %vm2332_vm0, %v2333_v1 }
 0x141   : > { %1900 = vmatpush3.bf16.msra.mxu0 %v1899_v9 }
 0x142   : > { %1852 = vmatprep.subr.mxu0 %v2333_v1 }
 0x144   : > { %1830 = vmatmul.mubr.msk.f32.vlgmr.msra.gmra.mrb[2].mxu0 %vm486_vm1, %v651_v28 }
 0x145   : > { %1854 = vmatprep.mubr.msk.f32.mxu0 %vm2332_vm0, %v2333_v1 }
 0x20f   : > { %v556_v31 = vpop.f32.mrb[0].mxu0  ;;  %v644_v39 = vpop.f32.mrb[0].mxu1 }
 0x210   : > { %v557_v32 = vadd.f32 %v556_v31, %v484_v30  ;;  %v1809_v33 = vpop.f32.mrb[1].mxu0  ;;  %v1820_v40 = vpop.f32.mrb[1].mxu1 }
 0x212   : > { %648 = vst.msk [vmem:[#allocation2] sm:$0xff] %vm486_vm1, %v557_v32 }
 0x217   : > { %v733_v34 = vpop.f32.mrb[2].mxu0 }
 0x218   : > { %v734_v35 = vadd.f32 %v2665_v10, %v733_v34  ;;  %v1831_v36 = vpop.f32.mrb[3].mxu0 }
 0x219   : > { %v738_v37 = vld [vmem:[#allocation2] sm:$0xff] }
 0x21a   : > { %v737_v38 = vmul.f32 0.35355338, %v734_v35  ;;  %1833 = vmatpush3.xpose.msk.msra.mxu1 %vm741_vm2, %v738_v37 }
 0x21b   : > { %1837 = vmatprep.subr.mxu1 %v2333_v1 }
 0x21d   : > { %1835 = vmatmul.mubr.msk.f32.vlgmr.msra.gmra.mrb[2].mxu1 %vm741_vm2, %v737_v38 }
 0x21e   : > { %1839 = vmatprep.mubr.msk.f32.mxu1 %vm2332_vm0, %v2333_v1 }
 0x2f0   : > { %v814_v41 = vpop.f32.mrb[2].mxu1 }
 0x2f1   : > { %v1836_v42 = vpop.f32.mrb[3].mxu1  ;;  %v818_v43 = vsel %vm741_vm2, %v814_v41, -inf }
 0x2f2   : > { %819 = vmax.xlane.f32.xlu1 %v818_v43  ;;  %v1425_v42 = vld [vmem:[#allocation12 + $0x8] sm:$0xff] }
 0x303   : > { %906 = vrot.lane.b32.xlu1 %v738_v37, %s2336_s14 }
 0x307   : > { %904 = vrot.lane.b32.xlu1 %v737_v38, %s2336_s14 }
 0x30b   : > { %1077 = vrot.lane.b32.xlu1 %v737_v38, %s2337_s23 }
 0x30f   : > { %1249 = vrot.lane.b32.xlu1 %v737_v38, %s2338_s18 }
 0x37f   : > { %v820_v44 = vpop.xlane.xlu1 %819 }
 0x380   : > { %v821_v45 = vsub.f32 %v814_v41, %v820_v44  ;;  %v1424_v41 = vld [vmem:[#allocation12] sm:$0xff]  ;;  %v1426_v44 = vld [vmem:[#allocation12 + $0x10] sm:$0xff] }
 0x381   : > { %v1902_v43 = vpack.c.bf16 %v1425_v42, %v1424_v41 }
 0x382   : > { %v822_v46 = vmul.f32 1.442695, %v821_v45  ;;  %v1427_v45 = vld [vmem:[#allocation12 + $0x18] sm:$0xff] }
 0x383   : > { %v907_v49 = vpop.permute.xlu1 %906 }
 0x384   : > { %2038 = vpow2.f32 %v822_v46  ;;  %v1905_v46 = vpack.c.bf16 %v1427_v45, %v1426_v44 }
 0x387   : > { %v905_v51 = vpop.permute.xlu1 %904 }
 0x38b   : > { %v1078_v55 = vpop.permute.xlu1 %1077 }
 0x38e   : > { %v2039_v47 = vpop.eup %2038 }
 0x38f   : > { %v824_v48 = vsel %vm741_vm2, %v2039_v47, 0.0  ;;  %v1250_v60 = vpop.permute.xlu1 %1249 }
 0x390   : > { %825 = vadd.xlane.f32.xlu0 %v824_v48 }
 0x3a6   : > { %572 = vrot.lane.b32.xlu0 %v2665_v10, %s2335_s25 }
 0x3aa   : > { %1079 = vrot.lane.b32.xlu0 %v738_v37, %s2337_s23 }
 0x3ae   : > { %1251 = vrot.lane.b32.xlu0 %v738_v37, %s2338_s18 }
 0x41d   : > { %v826_v50 = vpop.xlane.xlu0 %825 }
 0x41e   : > { %2040 = vrcp.f32 %v826_v50 }
 0x421   : > { %v573_v52 = vpop.permute.xlu0 %572 }
 0x422   : > { %v645_v53 = vadd.f32 %v644_v39, %v573_v52 }
 0x424   : > { %650 = vst.msk [vmem:[#allocation2 + $0x8] sm:$0xff] %vm486_vm1, %v645_v53 }
 0x425   : > { %v1080_v54 = vpop.permute.xlu0 %1079 }
 0x426   : > { %1853 = vmatpush3.xpose.msk.msra.mxu0 %vm741_vm2, %v1080_v54 }
 0x427   : > { %1862 = vmatprep.subr.mxu0 %v2333_v1 }
 0x428   : > { %v2041_v56 = vpop.eup %2040 }
 0x429   : > { %v1252_v57 = vpop.permute.xlu0 %1251  ;;  %1855 = vmatmul.mubr.msk.f32.vlgmr.msra.gmra.mrb[4].mxu0 %vm741_vm2, %v1078_v55  ;;  %v2715_v58 = vmul.f32 %v2041_v56, %v2039_v47 }
 0x42a   : > { %1863 = vmatpush3.xpose.msk.msra.mxu0 %vm741_vm2, %v1252_v57  ;;  %1864 = vmatprep.mubr.msk.f32.mxu0 %vm2332_vm0, %v2333_v1 }
 0x42b   : > { %v740_v59 = vld [vmem:[#allocation2 + $0x8] sm:$0xff]  ;;  %1901 = vmatprep.subr.bf16.mxu0 %v2331_v0 }
 0x42c   : > { %1838 = vmatpush3.msra.mxu1 %v740_v59 }
 0x42d   : > { %1840 = vmatmul.mubr.msk.f32.vlgmr.msra.gmra.mrb[4].mxu1 %vm741_vm2, %v2715_v58  ;;  %1865 = vmatmul.mubr.msk.f32.vlgmr.msra.gmra.mrb[6].mxu0 %vm741_vm2, %v1250_v60 }
 0x42e   : > { %1842 = vmatprep.subr.mxu1 %v2333_v1  ;;  %1844 = vmatprep.mubr.msk.f32.mxu1 %vm2332_vm0, %v2333_v1 }
 0x42f   : > { %1880 = vmatprep.mubr.msk.f32.mxu0 %vm2332_vm0, %v2333_v1  ;;  %1903 = vmatpush3.bf16.msra.mxu0 %v1902_v43 }
 0x430   : > { %1904 = vmatprep.subr.bf16.mxu0 %v2331_v0 }
 0x433   : > { %1843 = vmatpush3.xpose.msk.msra.mxu1 %vm741_vm2, %v907_v49  ;;  %1906 = vmatpush3.bf16.msra.mxu0 %v1905_v46 }
 0x434   : > { %1847 = vmatprep.subr.mxu1 %v2333_v1 }
 0x436   : > { %1845 = vmatmul.mubr.msk.f32.vlgmr.msra.gmra.mrb[6].mxu1 %vm741_vm2, %v905_v51 }
 0x437   : > { %1849 = vmatprep.mubr.msk.f32.mxu1 %vm2332_vm0, %v2333_v1 }
 0x4fc   : > { %v1151_v61 = vpop.f32.mrb[4].mxu0 }
 0x4fd   : > { %v1856_v62 = vpop.f32.mrb[5].mxu0  ;;  %v1155_v63 = vsel %vm741_vm2, %v1151_v61, -inf }
 0x4fe   : > { %1156 = vmax.xlane.f32.xlu1 %v1155_v63 }
 0x500   : > { %v899_v2 = vpop.f32.mrb[4].mxu1  ;;  %v1323_v3 = vpop.f32.mrb[6].mxu0 }
 0x501   : > { %903 = vst.msk [vmem:[#allocation3] sm:$0xff] %vm741_vm2, %v899_v2  ;;  %v1841_v4 = vpop.f32.mrb[5].mxu1  ;;  %v1866_v5 = vpop.f32.mrb[7].mxu0  ;;  %v1327_v9 = vsel %vm741_vm2, %v1323_v3, -inf }
 0x509   : > { %v978_v6 = vpop.f32.mrb[6].mxu1 }
 0x50a   : > { %v1846_v7 = vpop.f32.mrb[7].mxu1  ;;  %v982_v8 = vsel %vm741_vm2, %v978_v6, -inf }
 0x50b   : > { %983 = vmax.xlane.f32.xlu0 %v982_v8 }
 0x50f   : > { %1328 = vmax.xlane.f32.xlu0 %v1327_v9 }
 0x58b   : > { %v1157_v10 = vpop.xlane.xlu1 %1156 }
 0x58c   : > { %v1158_v11 = vsub.f32 %v1151_v61, %v1157_v10 }
 0x58e   : > { %v1159_v12 = vmul.f32 1.442695, %v1158_v11 }
 0x590   : > { %2042 = vpow2.f32 %v1159_v12 }
 0x598   : > { %v984_v13 = vpop.xlane.xlu0 %983 }
 0x599   : > { %v985_v15 = vsub.f32 %v978_v6, %v984_v13 }
 0x59a   : > { %v2043_v14 = vpop.eup %2042 }
 0x59b   : > { %v1161_v16 = vsel %vm741_vm2, %v2043_v14, 0.0  ;;  %v986_v19 = vmul.f32 1.442695, %v985_v15 }
 0x59c   : > { %1162 = vadd.xlane.f32.xlu1 %v1161_v16  ;;  %v1329_v17 = vpop.xlane.xlu0 %1328 }
 0x59d   : > { %v1330_v18 = vsub.f32 %v1323_v3, %v1329_v17 }
 0x59f   : > { %v1331_v20 = vmul.f32 1.442695, %v1330_v18 }
 0x5a1   : > { %2044 = vpow2.f32 %v1331_v20 }
 0x5a2   : > { %2046 = vpow2.f32 %v986_v19 }
 0x5ab   : > { %v2045_v21 = vpop.eup %2044 }
 0x5ac   : > { %v1333_v22 = vsel %vm741_vm2, %v2045_v21, 0.0  ;;  %v2047_v23 = vpop.eup %2046 }
 0x5ad   : > { %995 = vrot.lane.b32.xlu1 %v740_v59, %s2336_s14  ;;  %1334 = vadd.xlane.f32.xlu0 %v1333_v22  ;;  %v988_v24 = vsel %vm741_vm2, %v2047_v23, 0.0 }
 0x5b1   : > { %1339 = vrot.lane.b32.xlu1 %v740_v59, %s2338_s18  ;;  %989 = vadd.xlane.f32.xlu0 %v988_v24 }
 0x5c7   : > { %1167 = vrot.lane.b32.xlu0 %v740_v59, %s2337_s23 }
 0x629   : > { %v1163_v25 = vpop.xlane.xlu1 %1162 }
 0x62a   : > { %2048 = vrcp.f32 %v1163_v25 }
 0x62d   : > { %v996_v26 = vpop.permute.xlu1 %995 }
 0x62e   : > { %1848 = vmatpush3.msra.mxu1 %v996_v26 }
 0x62f   : > { %1857 = vmatprep.subr.mxu1 %v2333_v1 }
 0x631   : > { %v1340_v38 = vpop.permute.xlu1 %1339 }
 0x634   : > { %v2049_v29 = vpop.eup %2048 }
 0x635   : > { %v1165_v33 = vmul.f32 %v2049_v29, %v2043_v14 }
 0x63a   : > { %v1335_v27 = vpop.xlane.xlu0 %1334 }
 0x63e   : > { %v990_v28 = vpop.xlane.xlu0 %989 }
 0x63f   : > { %2050 = vrcp.f32 %v990_v28 }
 0x640   : > { %2052 = vrcp.f32 %v1335_v27 }
 0x642   : > { %v1168_v35 = vpop.permute.xlu0 %1167 }
 0x649   : > { %v2051_v30 = vpop.eup %2050 }
 0x64a   : > { %v992_v31 = vmul.f32 %v2051_v30, %v2047_v23  ;;  %v2053_v32 = vpop.eup %2052 }
 0x64b   : > { %v1337_v36 = vmul.f32 %v2053_v32, %v2045_v21 }
 0x64c   : > { %v993_v34 = vadd.f32 %v992_v31, %v2715_v58  ;;  %1850 = vmatmul.mubr.msk.f32.vlgmr.msra.gmra.mrb[8].mxu1 %vm741_vm2, %v992_v31 }
 0x64d   : > { %1858 = vmatpush3.msra.mxu1 %v1168_v35  ;;  %1859 = vmatprep.mubr.msk.f32.mxu1 %vm2332_vm0, %v2333_v1 }
 0x64e   : > { %v1166_v37 = vadd.f32 %v1165_v33, %v993_v34  ;;  %1867 = vmatprep.subr.mxu1 %v2333_v1 }
 0x650   : > { %1860 = vmatmul.mubr.msk.f32.vlgmr.msra.gmra.mrb[10].mxu1 %vm741_vm2, %v1165_v33  ;;  %v1338_v39 = vadd.f32 %v1337_v36, %v1166_v37 }
 0x651   : > { %1868 = vmatpush3.msra.mxu1 %v1340_v38  ;;  %1869 = vmatprep.mubr.msk.f32.mxu1 %vm2332_vm0, %v2333_v1 }
 0x652   : > { %v1421_v40 = vmul.f32 0.25, %v1338_v39 }
 0x654   : > { %1870 = vmatmul.mubr.msk.f32.vlgmr.msra.gmra.mrb[12].mxu1 %vm741_vm2, %v1337_v36  ;;  %1422 = vst.msk [vmem:[%s450_s12] sm:$0xff] %vm741_vm2, %v1421_v40 }
 0x71f   : > { %v1067_v47 = vpop.f32.mrb[8].mxu1 }
 0x720   : > { %1072 = vrot.lane.b32.xlu1 %v1067_v47, %s2339_s26  ;;  %v1851_v1 = vpop.f32.mrb[9].mxu1 }
 0x723   : > { %v1239_v48 = vpop.f32.mrb[10].mxu1 }
 0x724   : > { %1244 = vrot.lane.b32.xlu0 %v1239_v48, %s2340_s17  ;;  %v1861_v49 = vpop.f32.mrb[11].mxu1 }
 0x727   : > { %v1411_v50 = vpop.f32.mrb[12].mxu1 }
 0x728   : > { %1416 = vrot.lane.b32.xlu1 %v1411_v50, %s2341_s20  ;;  %v1871_v51 = vpop.f32.mrb[13].mxu1 }
 0x792   : > { %v1073_v52 = vpop.permute.xlu1 %1072 }
 0x793   : > { %1076 = vst.msk [vmem:[#allocation3] sm:$0xff] %vm1075_vm3, %v1073_v52 }
 0x796   : > { %v1245_v0 = vpop.permute.xlu0 %1244 }
 0x797   : > { %1248 = vst.msk [vmem:[#allocation3] sm:$0xff] %vm1247_vm4, %v1245_v0 }
 0x79a   : > { %v1417_v53 = vpop.permute.xlu1 %1416 }
 0x79b   : > { %1420 = vst.msk [vmem:[#allocation3] sm:$0xff] %vm1419_vm5, %v1417_v53 }
 0x7a2   : > { %v1423_v54 = vld [vmem:[#allocation3] sm:$0xff] }
 0x7a3   : > { %1881 = vmatmul.mubr.msk.f32.vlgmr.msra.gmra.mrb[8].mxu0 %vm486_vm1, %v1423_v54 }
 0x7a4   : > { %2213 = shalt.err (!%p2210_p8)
}
 0x7a5   : > { %s2214_s1 = scalar_lea.hbm %s2763_s10, 128  ;;  %s2218_s23 = scalar_lea.hbm %s2852_s8, 256 }
 0x7a6   : > { %p2215_p0 = scmp.ne.s32.totalorder %s2763_s10, %s2214_s1  ;;  %p2219_p7 = scmp.lt.u32.totalorder %s2763_s10, %s2852_s8 }
 0x7a7   : > { %p2220_p13 = scmp.lt.u32.totalorder %s2218_s23, %s2214_s1  ;;  %p2222_p2 = scmp.lt.u32.totalorder %s2214_s1, %s2763_s10 }
 0x7a8   : > { %p2216_p5 = pnand %p2215_p0, %p2906_p4 }
 0x7a9   : > { %p2221_p9 = por %p2220_p13, %p2219_p7 }
 0x7aa   : > { %p2217_p12 = pneg %p2216_p5 }
 0x7ab   : > { %p2223_p1 = por %p2222_p2, %p2221_p9 }
 0x7ad   : > { %p2224_p3 = pnand %p2223_p1, %p2217_p12 }
 0x7af   : > { %2227 = shalt.err (!%p2224_p3)
}
 0x7b0   : > { %1922 = dma.vmem_to_hbm [thread:$0]  (%p2906_p4), %s1544_s15, 128, %s2763_s10, %s1515_s21   ;;  %v1755_v55 = vld [vmem:[%s2850_s6] ss:$0 sm:$0xff] }
 0x7b1   : > { %s443_s20 = scalar_lea.vmem [#allocation13], %s2637_s19  ;;  %s2794_s27 = scalar_lea.hbm %s2851_s7, %s1759_s16 }
 0x7b2   : > { %s1529_s9 = sshll.u32 %s443_s20, 4  ;;  %s1510_s10 = scalar_lea.sflag [#allocation6], %s2634_s3  ;;  %s2796_s9 = int_to_ptr.vmem [resolvable:$true] %s1529_s9 }
 0x7b3   : > { %s2228_s15 = scalar_lea.vmem %s2796_s9, 128  ;;  %s2343_s19 = smov [#allocation13]  }
 0x7b4   : > { %p2229_p11 = scmp.ne.s32.totalorder %s2796_s9, %s2228_s15  ;;  %s2232_s30 = sshll.u32 %s2343_s19, 4  ;;  %s2233_s30 = int_to_ptr.vmem [resolvable:$false] %s2232_s30 }
 0x7b5   : > { %s2234_s21 = scalar_lea.vmem %s2233_s30, 256  ;;  %p2235_p8 = scmp.lt.s32.totalorder %s2796_s9, %s2233_s30 }
 0x7b6   : > { %p2230_p10 = pnand %p2229_p11, %p2906_p4  ;;  %p2236_p0 = scmp.lt.s32.totalorder %s2234_s21, %s2228_s15 }
 0x7b8   : > { %p2231_p6 = pneg %p2230_p10  ;;  %p2237_p5 = por %p2236_p0, %p2235_p8 }
 0x7ba   : > { %p2238_p12 = pnand %p2237_p5, %p2231_p6 }
 0x876   : > { %v1504_v56 = vpop.f32.mrb[8].mxu0 }
 0x877   : > { %v1505_v57 = vadd.f32 %v1755_v55, %v1504_v56  ;;  %v1882_v58 = vpop.f32.mrb[9].mxu0 }
 0x879   : > { %1508 = vst.msk [vmem:[%s443_s20] sm:$0xff] %vm486_vm1, %v1505_v57 }
 0x87a   : > { %2241 = shalt.err (!%p2238_p12)
}
 0x87b   : > { %s2242_s3 = scalar_lea.hbm %s2794_s27, 128  ;;  %s2246_s13 = scalar_lea.hbm %s2851_s7, 256 }
 0x87c   : > { %p2243_p7 = scmp.ne.s32.totalorder %s2794_s27, %s2242_s3  ;;  %p2247_p2 = scmp.lt.u32.totalorder %s2794_s27, %s2851_s7 }
 0x87d   : > { %p2248_p1 = scmp.lt.u32.totalorder %s2246_s13, %s2242_s3  ;;  %p2250_p11 = scmp.lt.u32.totalorder %s2242_s3, %s2794_s27 }
 0x87e   : > { %p2244_p13 = pnand %p2243_p7, %p2906_p4 }
 0x87f   : > { %p2249_p3 = por %p2248_p1, %p2247_p2 }
 0x880   : > { %p2245_p9 = pneg %p2244_p13 }
 0x881   : > { %p2251_p10 = por %p2250_p11, %p2249_p3 }
 0x883   : > { %p2252_p6 = pnand %p2251_p10, %p2245_p9 }
 0x885   : > { %2255 = shalt.err (!%p2252_p6)
}
 0x886   : > { %1921 = dma.vmem_to_hbm [thread:$0]  (%p2906_p4), %s2796_s9, 128, %s2794_s27, %s1510_s10  }
 0x887 PF: > { %s2907_s14 = sld [smem:[#allocation21_spill]]  ;;  %s2908_s23 = sld [smem:[#allocation24_spill]] }
 0x888   : > { %s2909_s18 = sld [smem:[#allocation23_spill]] }
 0x88d   : > { %s1555_s12 = sand.u32 1, %s2907_s14   ;;  %p2910_p8 = scmp.ne.s32.totalorder %s2908_s23, 0 }
 0x88e   : > { %p2911_p0 = scmp.ge.s32.totalorder %s2909_s18, 2  ;;  %s1556_s26 = scalar_lea.sflag [#allocation6], %s1555_s12 }
 0x890   : > { %p1943_p5 = pnand %p2911_p0, %p2910_p8 }
 0x892   : > { %2293 = dma.done.wait (!%p1943_p5), %s1556_s26, 128  }
 0x893   : > { %2295 = vsyncadd (!%p1943_p5), %s1556_s26, 4294967168  ;;  %s1565_s17 = scalar_lea.sflag [#allocation15], %s1555_s12 }
 0x894   : > { %2297 = dma.done.wait (!%p1943_p5), %s1565_s17, 128  }
 0x895   : > { %2299 = vsyncadd (!%p1943_p5), %s1565_s17, 4294967168  ;;  %s32_s10 = sadd.s32 1, %s2909_s18   ;;  %s2912_s24 = sld [smem:[#allocation26_spill]] }
 0x896   : > { %p29_p12 = scmp.ge.s32.totalorder %s32_s10, 4   ;;  %s2913_s30 = sld [smem:[#allocation22_spill]] }
 0x897   : > { %s2914_s9 = sld [smem:[#allocation25_spill]]  ;;  %s2915_s27 = smov %s2306_s28 }
 0x898   : > { %s2916_s28 = smov %s2310_s29  ;;  %31 = sbr.rel (!%p29_p12) target bundleno = 15 (0xf), region = 148 }
 0x89b   : > { %s2917_s29 = smov %s2912_s24 }
 0x89f   :  { %1570 = vsyncpa [#allocation5], 1 }
 0x8a0   :  { %1572 = vsyncpa [#allocation5 + $0x1], 1 }
 0x8a1   :  { %1573 = vsyncpa [#allocation8], 1 }
 0x8a2   :  { %1575 = vsyncpa [#allocation8 + $0x1], 1 }
 0x8a3   :  { %1576 = vsyncpa [#allocation11], 1 }
 0x8a4   :  { %1577 = vsyncpa [#allocation6], 1 }
 0x8a5   :  { %1579 = vsyncpa [#allocation6 + $0x1], 1 }
 0x8a6   :  { %1580 = vsyncpa [#allocation15], 1 }
 0x8a7   :  { %1582 = vsyncpa [#allocation15 + $0x1], 1 }

</bundles_post_ra>
